<compile_context>
chip_gen: v5e
topology: v5e:2x2
jax: 0.10.0
libtpu: 0.0.40
codegen_flags: <defaults>
</compile_context>

<pallas_src>
import jax
import jax.numpy as jnp
from jax import lax
from jax.experimental import pallas as pl
from jax.experimental.pallas import tpu as pltpu

_EPS = 1e-12  # F.normalize default eps


# ---------------------------------------------------------------------------
# Kernels
# ---------------------------------------------------------------------------

def _l2norm_kernel(x_ref, o_ref):
    # x_ref / o_ref: [TN, D] tile in VMEM (D lane-dense, multiple of 128).
    x = x_ref[...]
    xf = x.astype(jnp.float32)
    ss = jnp.sum(xf * xf, axis=1, keepdims=True)            # [TN, 1] f32 accumulate
    # 1 / max(sqrt(ss), eps)  ==  min(rsqrt(ss), 1/eps)   (monotone; ss==0 -> 1/eps)
    inv = jnp.minimum(lax.rsqrt(ss), jnp.float32(1.0 / _EPS))
    # Only the broadcasted `inv` is promoted; narrow inputs are not copied twice.
    o_ref[...] = (x * inv).astype(o_ref.dtype)


def _sumsq_kernel(x_ref, ss_ref):
    # Pass 1 of the large-D fallback: accumulate row sum-of-squares over D tiles.
    @pl.when(pl.program_id(1) == 0)
    def _():
        ss_ref[...] = jnp.zeros_like(ss_ref)

    xf = x_ref[...].astype(jnp.float32)
    ss_ref[...] += jnp.sum(xf * xf, axis=1, keepdims=True)


def _scale_kernel(x_ref, ss_ref, o_ref):
    # Pass 2 of the large-D fallback: scale each D tile by the row inverse norm.
    inv = jnp.minimum(lax.rsqrt(ss_ref[...]), jnp.float32(1.0 / _EPS))
    o_ref[...] = (x_ref[...] * inv).astype(o_ref.dtype)


# ---------------------------------------------------------------------------
# Sizing helpers
# ---------------------------------------------------------------------------

def _sublane(dtype):
    return {4: 8, 2: 16, 1: 32}.get(jnp.dtype(dtype).itemsize, 8)


def _vmem_budget_bytes():
    """Scoped-VMEM limit to request: ~75% of physical VMEM, capped at 96 MiB.

    v5e/v6e (128 MiB physical) -> 96 MiB; v7x (64 MiB physical) -> 48 MiB.
    """
    phys = 64 << 20
    try:
        info = pltpu.get_tpu_info()
        phys = int(getattr(info, "vmem_capacity_bytes", phys)) or phys
    except Exception:
        pass
    return min((phys * 3) // 4, 96 << 20)


def _choose_tn(n, d_pad, itemsize, sub, target_bytes):
    """Batch-tile size: biggest block <= target_bytes, but keep >= ~8 grid steps."""
    tn = (target_bytes // max(1, d_pad * itemsize)) // sub * sub
    tn = max(tn, sub)
    # Keep the pipeline in steady state (and both v7x cores busy) when N allows.
    min_steps = 8
    if n >= min_steps * sub:
        cap = max(sub, (pl.cdiv(n, min_steps) + sub - 1) // sub * sub)
        tn = min(tn, cap)
    if tn >= n:
        return n  # full-extent block along batch is always a legal block shape
    return tn


# ---------------------------------------------------------------------------
# Wrapper
# ---------------------------------------------------------------------------

def head_no_projection(x, donate_input=False):
    """x: [N, C, H, W] (NCHW). Returns L2-row-normalized [N, C*H*W]."""
    n = x.shape[0]
    d = 1
    for s in x.shape[1:]:
        d *= s
    x_flat = x.reshape(n, d)  # glue: torch.flatten(x, 1)

    dtype = x_flat.dtype
    itemsize = jnp.dtype(dtype).itemsize
    sub = _sublane(dtype)

    budget = _vmem_budget_bytes()
    target = budget // 6  # 2 in + 2 out double buffers + in-kernel temps <= budget

    # Lane-dense output: pad D up to a multiple of 128 (zeros don't change the norm).
    d_pad = pl.cdiv(d, 128) * 128
    x_in = x_flat if d_pad == d else jnp.pad(x_flat, ((0, 0), (0, d_pad - d)))

    cost = pl.CostEstimate(
        flops=3 * n * d_pad,
        transcendentals=n,
        bytes_accessed=2 * n * d_pad * itemsize,
    )

    min_block_bytes = sub * d_pad * itemsize

    if min_block_bytes <= target:
        # ------------------ single-pass path (common case) ------------------
        tn = _choose_tn(n, d_pad, itemsize, sub, target)
        grid = (pl.cdiv(n, tn),)

        # Optional HBM saving: reuse the input buffer for the output (only when
        # no padding copy was made and the caller no longer needs x_flat).
        io_aliases = {0: 0} if (donate_input and d_pad == d) else {}

        out = pl.pallas_call(
            _l2norm_kernel,
            out_shape=jax.ShapeDtypeStruct((n, d_pad), dtype),
            grid_spec=pl.GridSpec(
                grid=grid,
                in_specs=[pl.BlockSpec((tn, d_pad), lambda i: (i, 0))],
                out_specs=pl.BlockSpec((tn, d_pad), lambda i: (i, 0)),
            ),
            compiler_params=pltpu.CompilerParams(
                # Rows are independent -> parallel axis.
                # TODO(synk): on v7x, if "parallel" does not shard the grid
                # across both TensorCores, switch this axis to pltpu.CORE_PARALLEL.
                dimension_semantics=("parallel",),
                vmem_limit_bytes=budget,
            ),
            input_output_aliases=io_aliases,
            cost_estimate=cost,
        )(x_in)
    else:
        # ------------- large-D fallback: two-pass, D tiled -------------
        if n <= sub:
            tn = n
        else:
            tn = sub * min(8, n // sub)
        td = max(128, (target // max(1, tn * itemsize)) // 128 * 128)
        td = min(td, d_pad)
        # Pad D to a multiple of td so remainder D-blocks never mix garbage
        # columns into the row sums (padding is zeros -> norm unchanged).
        d_full = pl.cdiv(d_pad, td) * td
        if d_full != x_in.shape[1]:
            x_in = jnp.pad(x_in, ((0, 0), (0, d_full - x_in.shape[1])))
        grid = (pl.cdiv(n, tn), d_full // td)

        ss = pl.pallas_call(
            _sumsq_kernel,
            out_shape=jax.ShapeDtypeStruct((n, 1), jnp.float32),
            grid_spec=pl.GridSpec(
                grid=grid,
                in_specs=[pl.BlockSpec((tn, td), lambda i, j: (i, j))],
                out_specs=pl.BlockSpec((tn, 1), lambda i, j: (i, 0)),
            ),
            compiler_params=pltpu.CompilerParams(
                dimension_semantics=("parallel", "arbitrary"),
                vmem_limit_bytes=budget,
            ),
        )(x_in)

        out = pl.pallas_call(
            _scale_kernel,
            out_shape=jax.ShapeDtypeStruct((n, d_full), dtype),
            grid_spec=pl.GridSpec(
                grid=grid,
                in_specs=[pl.BlockSpec((tn, td), lambda i, j: (i, j)),
                          pl.BlockSpec((tn, 1), lambda i, j: (i, 0))],
                out_specs=pl.BlockSpec((tn, td), lambda i, j: (i, j)),
            ),
            compiler_params=pltpu.CompilerParams(
                dimension_semantics=("parallel", "parallel"),
                vmem_limit_bytes=budget,
            ),
            cost_estimate=cost,
        )(x_in, ss)

    if out.shape[1] != d:
        out = out[:, :d]
    return out


def init_params(embed_dim=128, c=2048, seed=0):
    """Deterministic init of the (unused) fc Linear(c, embed_dim) parameters."""
    k_w, k_b = jax.random.split(jax.random.PRNGKey(seed))
    bound = 1.0 / jnp.sqrt(c)
    fc_w = jax.random.uniform(k_w, (embed_dim, c), jnp.float32, -bound, bound)
    fc_b = jax.random.uniform(k_b, (embed_dim,), jnp.float32, -bound, bound)
    return {"fc_w": fc_w, "fc_b": fc_b}  # unused in forward (matches PyTorch)


def _ref_normalize(x):
    x_flat = x.reshape(x.shape[0], -1)
    return x_flat / jnp.maximum(
        jnp.linalg.norm(x_flat, axis=1, keepdims=True), _EPS
    )


if __name__ == "__main__":
    key = jax.random.PRNGKey(0)
    k1, k2 = jax.random.split(key)

    # Small shapes: N=2, C=4, H=W=16 -> flattened D = 1024 (stands in for c=2048).
    x = jax.random.normal(k1, (2, 4, 16, 16), dtype=jnp.float32)
    _ = init_params(embed_dim=128, c=4 * 16 * 16)  # parameters exist but are unused

    y = head_no_projection(x)
    y = jax.block_until_ready(y)
    assert y.shape == (2, 4 * 16 * 16)
    assert jnp.allclose(y, _ref_normalize(x), atol=1e-6, rtol=1e-6)

    # Exercise the lane-padding path: D = 3*5*7 = 105 (not a multiple of 128).
    x2 = jax.random.normal(k2, (4, 3, 5, 7), dtype=jnp.float32)
    y2 = jax.block_until_ready(head_no_projection(x2))
    assert y2.shape == (4, 105)
    assert jnp.allclose(y2, _ref_normalize(x2), atol=1e-6, rtol=1e-6)

    print("KERNEL_OK")
</pallas_src>

<mosaic_0001>
module attributes {stable_mosaic.version = 11 : i64} {
  func.func @_l2norm_kernel(%arg0: i32, %arg1: memref<2x1024xf32, #tpu.memory_space<vmem>>, %arg2: memref<2x1024xf32, #tpu.memory_space<vmem>>) attributes {dimension_semantics = [#tpu.dimension_semantics<parallel>], iteration_bounds = array<i64: 1>, scalar_prefetch = 0 : i64, scratch_operands = 0 : i64, tpu.core_type = #tpu.core_type<tc>, window_params = [{transform_indices = @transform_0, window_bounds = array<i64: 2, 1024>}, {transform_indices = @transform_1, window_bounds = array<i64: 2, 1024>}]} {
    %c0 = arith.constant 0 : index
    %c0_0 = arith.constant 0 : index
    %0 = vector.load %arg1[%c0, %c0_0] : memref<2x1024xf32, #tpu.memory_space<vmem>>, vector<2x1024xf32>
    %1 = arith.mulf %0, %0 : vector<2x1024xf32>
    %cst = arith.constant dense<0.000000e+00> : vector<2xf32>
    %2 = vector.multi_reduction <add>, %1, %cst [1] : vector<2x1024xf32> to vector<2xf32>
    %3 = vector.shape_cast %2 : vector<2xf32> to vector<2x1xf32>
    %4 = math.rsqrt %3 : vector<2x1xf32>
    %cst_1 = arith.constant 9.99999995E+11 : f32
    %5 = vector.broadcast %cst_1 : f32 to vector<2x1xf32>
    %6 = arith.minimumf %4, %5 : vector<2x1xf32>
    %7 = vector.broadcast %6 : vector<2x1xf32> to vector<2x1024xf32>
    %8 = arith.mulf %0, %7 : vector<2x1024xf32>
    %c0_2 = arith.constant 0 : index
    %c0_3 = arith.constant 0 : index
    %9 = vector.load %arg2[%c0_2, %c0_3] : memref<2x1024xf32, #tpu.memory_space<vmem>>, vector<2x1024xf32>
    tpu.vector_store %arg2[%c0_2, %c0_3], %8 {strides = array<i32>} : memref<2x1024xf32, #tpu.memory_space<vmem>>, vector<2x1024xf32>,
    return
  }
  func.func @transform_0(%arg0: i32) -> (i32, i32) {
    %c0_i32 = arith.constant 0 : i32
    %c0_i32_0 = arith.constant 0 : i32
    return %arg0, %c0_i32 : i32, i32
  }
  func.func @transform_1(%arg0: i32) -> (i32, i32) {
    %c0_i32 = arith.constant 0 : i32
    %c0_i32_0 = arith.constant 0 : i32
    return %arg0, %c0_i32 : i32, i32
  }
}

</mosaic_0001>

<bundles_post_ra>
// kernel: tpu_custom_call.1
= control target key start
LH: loop header
LB: loop body
LE: loop exit
PB: predicated region body
PF: predicated region fallthrough
CT: control target
= control target key end

     0   :  { %6 = vsyncpa [#allocation3], 0  ;;  %s188_s0 = inlined_call_operand.hbm [shape: f32[2,1024], index: 0, kind: input, shape index: {}]   ;;  %s189_s1 = inlined_call_operand.hbm [shape: f32[2,1024], index: 1, kind: output, shape index: {}]  }
   0x1   :  { %7 = vsyncpa [#allocation4], 0  ;;  %s13_s8 = sshll.u32 %s188_s0, 4  ;;  %s161_s9 = smov [#allocation2]   ;;  %s14_s8 = int_to_ptr.hbm [resolvable:$true] %s13_s8 }
   0x2   :  { %s15_s10 = sshll.u32 %s161_s9, 4  ;;  %s16_s10 = int_to_ptr.vmem [resolvable:$true] %s15_s10 }
   0x3   :  { %18 = dma.hbm_to_vmem [thread:$0]  %s14_s8, 256, %s16_s10, [#allocation3]  }
   0x4   :  { %157 = dma.done.wait [#allocation3], 256  }
   0x5   :  { %158 = vsyncadd [#allocation3], 4294967040  ;;  %v23_v0 = vld [vmem:[#allocation2] sm:$0xff]  ;;  %v24_v1 = vld [vmem:[#allocation2 + $0x8] sm:$0xff]  ;;  %vm48_vm0 = vcmask 1041408   ;;  %s163_s0 = smov [#allocation5]  }
   0x6   :  { %v25_v2 = vmul.f32 %v23_v0, %v23_v0  ;;  %v26_v3 = vmul.f32 %v24_v1, %v24_v1  ;;  %v162_v32 = vmov 269488144   ;;  %s92_s11 = sshll.u32 %s163_s0, 4  ;;  %s94_s14 = sshll.u32 %s189_s1, 4  ;;  %s93_s11 = int_to_ptr.vmem [resolvable:$true] %s92_s11  ;;  %s95_s14 = int_to_ptr.hbm [resolvable:$true] %s94_s14 }
   0x7   :  { %v79_v33 = vunpack.c.l.s4 %v162_v32 }
   0x8   :  { %29 = vst [vmem:[#allocation1] ss:$4 sm:$0xff] %v25_v2 }
   0x9   :  { %31 = vst [vmem:[#allocation1 + $0x20] ss:$4 sm:$0xff] %v26_v3  ;;  %v80_v36 = vunpack.c.0.s8 %v79_v33 }
   0xf   :  { %v32_v4 = vld.sshfl [vmem:[#allocation1] sm:$0xff pattern:$0x73625140]  ;;  %v33_v5 = vld.sshfl [vmem:[#allocation1 + $0x8] sm:$0xff pattern:$0x73625140] }
  0x10   :  { %v34_v6 = vld.sshfl [vmem:[#allocation1 + $0x10] sm:$0xff pattern:$0x73625140]  ;;  %v35_v7 = vld.sshfl [vmem:[#allocation1 + $0x18] sm:$0xff pattern:$0x73625140] }
  0x11   :  { %v49_v8 = vsel %vm48_vm0, %v32_v4, 0.0  ;;  %v50_v9 = vsel %vm48_vm0, %v33_v5, 0.0  ;;  %v52_v10 = vsel %vm48_vm0, %v34_v6, 0.0  ;;  %v36_v11 = vld.sshfl [vmem:[#allocation1 + $0x20] sm:$0xff pattern:$0x73625140] }
  0x12   :  { %v51_v12 = vadd.f32 %v50_v9, %v49_v8  ;;  %v54_v13 = vsel %vm48_vm0, %v35_v7, 0.0  ;;  %v37_v14 = vld.sshfl [vmem:[#allocation1 + $0x28] sm:$0xff pattern:$0x73625140]  ;;  %v56_v16 = vsel %vm48_vm0, %v36_v11, 0.0 }
  0x13   :  { %v38_v17 = vld.sshfl [vmem:[#allocation1 + $0x30] sm:$0xff pattern:$0x73625140]  ;;  %v58_v19 = vsel %vm48_vm0, %v37_v14, 0.0 }
  0x14   :  { %v53_v15 = vadd.f32 %v52_v10, %v51_v12  ;;  %v39_v20 = vld.sshfl [vmem:[#allocation1 + $0x38] sm:$0xff pattern:$0x73625140]  ;;  %v60_v22 = vsel %vm48_vm0, %v38_v17, 0.0 }
  0x15   :  { %v62_v24 = vsel %vm48_vm0, %v39_v20, 0.0 }
  0x16   :  { %v55_v18 = vadd.f32 %v54_v13, %v53_v15 }
  0x18   :  { %v57_v21 = vadd.f32 %v56_v16, %v55_v18 }
  0x1a   :  { %v59_v23 = vadd.f32 %v58_v19, %v57_v21 }
  0x1c   :  { %v61_v25 = vadd.f32 %v60_v22, %v59_v23 }
  0x1e   :  { %v63_v26 = vadd.f32 %v62_v24, %v61_v25 }
  0x20   :  { %64 = vadd.xlane.f32.xlu0 %v63_v26 }
  0x93   :  { %v65_v27 = vpop.xlane.xlu0 %64 }
  0x94   :  { %107 = vrsqrt.f32 %v65_v27  ;;  %vm72_vm2 = vweird.f32 %v65_v27 }
  0x9a   :  { %v108_v28 = vpop.eup %107 }
  0x9b   :  { %v67_v29 = vmul.f32 %v108_v28, %v65_v27  ;;  %vm73_vm1 = vweird.f32 %v108_v28 }
  0x9c   :  { %vm74_vm3 = vmor %vm72_vm2, %vm73_vm1 }
  0x9d   :  { %v68_v30 = vmul.f32 %v108_v28, %v67_v29 }
  0x9f   :  { %v69_v31 = vmul.f32 0.5, %v68_v30 }
  0xa1   :  { %v70_v34 = vsub.f32 1.5, %v69_v31 }
  0xa3   :  { %v71_v35 = vmul.f32 %v108_v28, %v70_v34 }
  0xa5   :  { %v75_v37 = vsel %vm74_vm3, %v108_v28, %v71_v35 }
  0xa6   :  { %v76_v38 = vmin.f32 %v75_v37, 1e+12 }
  0xa8   :  { %v81_v39 = vperm.slane %v76_v38, %v80_v36 }
  0xaa   :  { %v83_v40 = vmul.f32 %v81_v39, %v23_v0  ;;  %v84_v41 = vmul.f32 %v81_v39, %v24_v1 }
  0xac   :  { %85 = vst [vmem:[#allocation5] sm:$0xff] %v83_v40 }
  0xad   :  { %86 = vst [vmem:[#allocation5 + $0x8] sm:$0xff] %v84_v41 }
  0xae   :  { %97 = dma.vmem_to_hbm [thread:$0]  %s93_s11, 256, %s95_s14, [#allocation4]  }
  0xaf   :  { %159 = dma.done.wait [#allocation4], 256  }
  0xb0   :  { %160 = vsyncadd [#allocation4], 4294967040 }
  0xb1   :  { %102 = vsyncpa [#allocation3], 1 }
  0xb2   :  { %103 = vsyncpa [#allocation4], 1 }

</bundles_post_ra>
